<compile_context>
chip_gen: v7x
topology: tpu7x:2x2x1
jax: 0.10.0
libtpu: 0.0.40
codegen_flags: <defaults>
</compile_context>

<pallas_src>
import functools

import jax
import jax.numpy as jnp
from jax.experimental import pallas as pl
from jax.experimental.pallas import tpu as pltpu


HIDDEN = 32
NUM_HEADS = 4
HEAD_DIM = HIDDEN // NUM_HEADS
LN_EPS = 1e-5            # nn.LayerNorm default
NEG_INF = -1e30          # large finite negative: NaN-safe masking


def _layernorm(v, gamma, beta):
    mu = jnp.mean(v, axis=-1, keepdims=True)
    var = jnp.mean((v - mu) ** 2, axis=-1, keepdims=True)
    return (v - mu) * jax.lax.rsqrt(var + LN_EPS) * gamma + beta


def encoder_block_kernel(
    x_ref,                                        # (B*S, H)
    wqkv_ref,                                     # (H, 3H), Q columns pre-scaled
    wo_ref,                                       # (H, H)
    ln1_g_ref, ln1_b_ref, ln2_g_ref, ln2_b_ref,   # (1, H) each
    w1_ref, b1_ref, w2_ref, b2_ref,               # FFN: (H, H), (1, H)
    o_ref,                                        # (B*S, H)
    *, batch, seq,
):
    x = x_ref[...]                                # (B*S, H)
    BS, H = x.shape

    # ---- LN1 ----
    x1 = _layernorm(x, ln1_g_ref[...], ln1_b_ref[...])

    # ---- fused QKV projection: one MXU push for all three projections ----
    qkv = jnp.dot(x1, wqkv_ref[...], preferred_element_type=jnp.float32)   # (BS, 3H)
    q = qkv[:, 0 * H:1 * H].reshape(batch, seq, H)
    k = qkv[:, 1 * H:2 * H].reshape(batch, seq, H)
    v = qkv[:, 2 * H:3 * H].reshape(batch, seq, H)

    # causal mask shared across batch & heads
    row = jax.lax.broadcasted_iota(jnp.int32, (batch, seq, seq), 1)
    col = jax.lax.broadcasted_iota(jnp.int32, (batch, seq, seq), 2)
    causal = col <= row

    # ---- multi-head causal self-attention, batched over B per head;
    #      head outputs accumulated directly through Wo (no concat) ----
    attn_proj = jnp.zeros((BS, H), jnp.float32)
    for h in range(NUM_HEADS):
        sl = slice(h * HEAD_DIM, (h + 1) * HEAD_DIM)
        qh, kh, vh = q[:, :, sl], k[:, :, sl], v[:, :, sl]            # (B, S, d)
        s = jnp.einsum("bqd,bkd->bqk", qh, kh,
                       preferred_element_type=jnp.float32)            # (B, S, S)
        s = jnp.where(causal, s, NEG_INF)
        m = jnp.max(s, axis=-1, keepdims=True)
        e = jnp.exp(s - m)
        p = e * pl.reciprocal(jnp.sum(e, axis=-1, keepdims=True), approx=True)
        oh = jnp.einsum("bqk,bkd->bqd", p, vh,
                        preferred_element_type=jnp.float32)           # (B, S, d)
        attn_proj = attn_proj + jnp.dot(
            oh.reshape(BS, HEAD_DIM), wo_ref[sl, :],
            preferred_element_type=jnp.float32)

    # dropout == identity in eval mode
    x2 = x + attn_proj

    # ---- LN2 + position-wise FFN ----
    x3 = _layernorm(x2, ln2_g_ref[...], ln2_b_ref[...])
    h1 = jnp.maximum(
        jnp.dot(x3, w1_ref[...], preferred_element_type=jnp.float32) + b1_ref[...],
        0.0,
    )
    ffn_out = jnp.dot(h1, w2_ref[...], preferred_element_type=jnp.float32) + b2_ref[...]

    o_ref[...] = (x2 + ffn_out).astype(o_ref.dtype)


def encoder_block(x, packed):
    """x: (B, S, H) float32.  packed: dict from pack_params()."""
    B, S, H = x.shape
    assert H == HIDDEN
    BS = B * S
    x_flat = x.reshape(BS, H)   # flatten batch into rows outside the kernel

    def full2d(shape):
        return pl.BlockSpec(shape, lambda i: (0, 0))

    out_flat = pl.pallas_call(
        functools.partial(encoder_block_kernel, batch=B, seq=S),
        out_shape=jax.ShapeDtypeStruct((BS, H), x.dtype),
        grid=(1,),
        in_specs=[
            full2d((BS, H)),                                            # x
            full2d((H, 3 * H)),                                         # Wqkv
            full2d((H, H)),                                             # Wo
            full2d((1, H)), full2d((1, H)), full2d((1, H)), full2d((1, H)),  # LN g/b
            full2d((H, H)), full2d((1, H)), full2d((H, H)), full2d((1, H)),  # FFN
        ],
        out_specs=full2d((BS, H)),
        compiler_params=pltpu.CompilerParams(dimension_semantics=("arbitrary",)),
    )(
        x_flat,
        packed["wqkv"], packed["wo"],
        packed["ln1_g"], packed["ln1_b"], packed["ln2_g"], packed["ln2_b"],
        packed["w1"], packed["b1"], packed["w2"], packed["b2"],
    )
    return out_flat.reshape(B, S, H)


def init_params(key, hidden=HIDDEN):
    ks = jax.random.split(key, 6)
    std = 1.0 / jnp.sqrt(jnp.float32(hidden))
    return {
        # attention projections, stored as (in, out) == PyTorch W.T
        "wq": jax.random.normal(ks[0], (hidden, hidden), jnp.float32) * std,
        "wk": jax.random.normal(ks[1], (hidden, hidden), jnp.float32) * std,
        "wv": jax.random.normal(ks[2], (hidden, hidden), jnp.float32) * std,
        "wo": jax.random.normal(ks[3], (hidden, hidden), jnp.float32) * std,
        # LayerNorm affine params (default init: gamma=1, beta=0)
        "ln1_g": jnp.ones((1, hidden), jnp.float32),
        "ln1_b": jnp.zeros((1, hidden), jnp.float32),
        "ln2_g": jnp.ones((1, hidden), jnp.float32),
        "ln2_b": jnp.zeros((1, hidden), jnp.float32),
        # FFN: kaiming_normal-ish init, zero bias (matches PositionwiseFFN init)
        "w1": jax.random.normal(ks[4], (hidden, hidden), jnp.float32)
        * jnp.sqrt(2.0 / hidden),
        "b1": jnp.zeros((1, hidden), jnp.float32),
        "w2": jax.random.normal(ks[5], (hidden, hidden), jnp.float32)
        * jnp.sqrt(2.0 / hidden),
        "b2": jnp.zeros((1, hidden), jnp.float32),
    }


def pack_params(p):
    """One-time weight transform: fuse QKV and fold the 1/sqrt(d) score scale
    into the Q columns."""
    scale = 1.0 / (HEAD_DIM ** 0.5)
    packed = dict(p)
    packed["wqkv"] = jnp.concatenate([p["wq"] * scale, p["wk"], p["wv"]], axis=1)
    return packed


def encoder_block_ref(x, p):
    """Pure-JAX reference of the PyTorch forward (eval mode)."""
    def ln(v, g, b):
        mu = jnp.mean(v, axis=-1, keepdims=True)
        var = jnp.mean((v - mu) ** 2, axis=-1, keepdims=True)
        return (v - mu) / jnp.sqrt(var + LN_EPS) * g[0] + b[0]

    B, S, H = x.shape
    x1 = ln(x, p["ln1_g"], p["ln1_b"])
    q = x1 @ p["wq"]; k = x1 @ p["wk"]; v = x1 @ p["wv"]

    def split(t):
        return t.reshape(B, S, NUM_HEADS, HEAD_DIM).transpose(0, 2, 1, 3)

    Q, K, V = split(q), split(k), split(v)
    s = jnp.einsum("bhqd,bhkd->bhqk", Q, K) / jnp.sqrt(jnp.float32(HEAD_DIM))
    mask = jnp.tril(jnp.ones((S, S), bool))
    s = jnp.where(mask[None, None], s, -jnp.inf)
    pbs = jax.nn.softmax(s, axis=-1)
    a = jnp.einsum("bhqk,bhkd->bhqd", pbs, V).transpose(0, 2, 1, 3).reshape(B, S, H)
    x2 = x + a @ p["wo"]
    x3 = ln(x2, p["ln2_g"], p["ln2_b"])
    h1 = jnp.maximum(x3 @ p["w1"] + p["b1"][0], 0.0)
    return x2 + (h1 @ p["w2"] + p["b2"][0])


if __name__ == "__main__":
    key = jax.random.PRNGKey(0)
    k_x, k_p = jax.random.split(key)

    B, S, H = 2, 8, HIDDEN
    x = jax.random.normal(k_x, (B, S, H), jnp.float32)
    params = init_params(k_p)
    packed = pack_params(params)   # one-time weight transform (not per call)

    out = jax.block_until_ready(encoder_block(x, packed))
    ref = encoder_block_ref(x, params)

    assert out.shape == (B, S, H)
    # tolerance accounts for the EUP approximate reciprocal in the softmax
    assert jnp.allclose(out, ref, atol=3e-2, rtol=3e-2), (
        f"max err {jnp.max(jnp.abs(out - ref))}"
    )
    print("KERNEL_OK")
</pallas_src>

<mosaic_0001>
module attributes {stable_mosaic.version = 11 : i64} {
  func.func @encoder_block_kernel(%arg0: i32, %arg1: memref<16x32xf32, #tpu.memory_space<vmem>>, %arg2: memref<32x96xf32, #tpu.memory_space<vmem>>, %arg3: memref<32x32xf32, #tpu.memory_space<vmem>>, %arg4: memref<1x32xf32, #tpu.memory_space<vmem>>, %arg5: memref<1x32xf32, #tpu.memory_space<vmem>>, %arg6: memref<1x32xf32, #tpu.memory_space<vmem>>, %arg7: memref<1x32xf32, #tpu.memory_space<vmem>>, %arg8: memref<32x32xf32, #tpu.memory_space<vmem>>, %arg9: memref<1x32xf32, #tpu.memory_space<vmem>>, %arg10: memref<32x32xf32, #tpu.memory_space<vmem>>, %arg11: memref<1x32xf32, #tpu.memory_space<vmem>>, %arg12: memref<16x32xf32, #tpu.memory_space<vmem>>) attributes {dimension_semantics = [#tpu.dimension_semantics<arbitrary>], iteration_bounds = array<i64: 1>, scalar_prefetch = 0 : i64, scratch_operands = 0 : i64, tpu.core_type = #tpu.core_type<tc>, window_params = [{pipeline_mode = #tpu.pipeline_mode<synchronous>, transform_indices = @transform_0, window_bounds = array<i64: 16, 32>}, {pipeline_mode = #tpu.pipeline_mode<synchronous>, transform_indices = @transform_1, window_bounds = array<i64: 32, 96>}, {pipeline_mode = #tpu.pipeline_mode<synchronous>, transform_indices = @transform_2, window_bounds = array<i64: 32, 32>}, {pipeline_mode = #tpu.pipeline_mode<synchronous>, transform_indices = @transform_3, window_bounds = array<i64: 1, 32>}, {pipeline_mode = #tpu.pipeline_mode<synchronous>, transform_indices = @transform_4, window_bounds = array<i64: 1, 32>}, {pipeline_mode = #tpu.pipeline_mode<synchronous>, transform_indices = @transform_5, window_bounds = array<i64: 1, 32>}, {pipeline_mode = #tpu.pipeline_mode<synchronous>, transform_indices = @transform_6, window_bounds = array<i64: 1, 32>}, {pipeline_mode = #tpu.pipeline_mode<synchronous>, transform_indices = @transform_7, window_bounds = array<i64: 32, 32>}, {pipeline_mode = #tpu.pipeline_mode<synchronous>, transform_indices = @transform_8, window_bounds = array<i64: 1, 32>}, {pipeline_mode = #tpu.pipeline_mode<synchronous>, transform_indices = @transform_9, window_bounds = array<i64: 32, 32>}, {pipeline_mode = #tpu.pipeline_mode<synchronous>, transform_indices = @transform_10, window_bounds = array<i64: 1, 32>}, {pipeline_mode = #tpu.pipeline_mode<synchronous>, transform_indices = @transform_11, window_bounds = array<i64: 16, 32>}]} {
    %c0 = arith.constant 0 : index
    %c0_0 = arith.constant 0 : index
    %0 = vector.load %arg1[%c0, %c0_0] : memref<16x32xf32, #tpu.memory_space<vmem>>, vector<16x32xf32>
    %c0_1 = arith.constant 0 : index
    %c0_2 = arith.constant 0 : index
    %1 = vector.load %arg4[%c0_1, %c0_2] : memref<1x32xf32, #tpu.memory_space<vmem>>, vector<1x32xf32>
    %c0_3 = arith.constant 0 : index
    %c0_4 = arith.constant 0 : index
    %2 = vector.load %arg5[%c0_3, %c0_4] : memref<1x32xf32, #tpu.memory_space<vmem>>, vector<1x32xf32>
    %cst = arith.constant dense<0.000000e+00> : vector<16xf32>
    %3 = vector.multi_reduction <add>, %0, %cst [1] : vector<16x32xf32> to vector<16xf32>
    %4 = vector.shape_cast %3 : vector<16xf32> to vector<16x1xf32>
    %cst_5 = arith.constant 3.200000e+01 : f32
    %5 = vector.broadcast %cst_5 : f32 to vector<16x1xf32>
    %6 = arith.divf %4, %5 : vector<16x1xf32>
    %7 = vector.broadcast %6 : vector<16x1xf32> to vector<16x32xf32>
    %8 = arith.subf %0, %7 : vector<16x32xf32>
    %9 = arith.mulf %8, %8 : vector<16x32xf32>
    %cst_6 = arith.constant dense<0.000000e+00> : vector<16xf32>
    %10 = vector.multi_reduction <add>, %9, %cst_6 [1] : vector<16x32xf32> to vector<16xf32>
    %11 = vector.shape_cast %10 : vector<16xf32> to vector<16x1xf32>
    %cst_7 = arith.constant 3.200000e+01 : f32
    %12 = vector.broadcast %cst_7 : f32 to vector<16x1xf32>
    %13 = arith.divf %11, %12 : vector<16x1xf32>
    %14 = vector.broadcast %6 : vector<16x1xf32> to vector<16x32xf32>
    %15 = arith.subf %0, %14 : vector<16x32xf32>
    %cst_8 = arith.constant 9.99999974E-6 : f32
    %16 = vector.broadcast %cst_8 : f32 to vector<16x1xf32>
    %17 = arith.addf %13, %16 : vector<16x1xf32>
    %18 = math.rsqrt %17 : vector<16x1xf32>
    %19 = vector.broadcast %18 : vector<16x1xf32> to vector<16x32xf32>
    %20 = arith.mulf %15, %19 : vector<16x32xf32>
    %21 = vector.broadcast %1 : vector<1x32xf32> to vector<16x32xf32>
    %22 = arith.mulf %20, %21 : vector<16x32xf32>
    %23 = vector.broadcast %2 : vector<1x32xf32> to vector<16x32xf32>
    %24 = arith.addf %22, %23 : vector<16x32xf32>
    %c0_9 = arith.constant 0 : index
    %c0_10 = arith.constant 0 : index
    %25 = vector.load %arg2[%c0_9, %c0_10] : memref<32x96xf32, #tpu.memory_space<vmem>>, vector<32x96xf32>
    %cst_11 = arith.constant dense<0.000000e+00> : vector<16x96xf32>
    %26 = tpu.matmul %24, %25, %cst_11 {dimension_numbers = #tpu.dot_dimension_numbers<[1], [0], [0], [1], [0, 0, 1, 1], [], []>} : vector<16x32xf32>, vector<32x96xf32>, vector<16x96xf32> -> vector<16x96xf32>
    %27 = vector.extract_strided_slice %26 {offsets = [0, 0], sizes = [16, 32], strides = [1, 1]} : vector<16x96xf32> to vector<16x32xf32>
    %28 = vector.shape_cast %27 : vector<16x32xf32> to vector<2x8x32xf32>
    %29 = vector.extract_strided_slice %26 {offsets = [0, 32], sizes = [16, 32], strides = [1, 1]} : vector<16x96xf32> to vector<16x32xf32>
    %30 = vector.shape_cast %29 : vector<16x32xf32> to vector<2x8x32xf32>
    %31 = vector.extract_strided_slice %26 {offsets = [0, 64], sizes = [16, 32], strides = [1, 1]} : vector<16x96xf32> to vector<16x32xf32>
    %32 = vector.shape_cast %31 : vector<16x32xf32> to vector<2x8x32xf32>
    %33 = tpu.iota {dimensions = array<i32: 1>} : vector<2x8x8xi32>
    %34 = tpu.iota {dimensions = array<i32: 2>} : vector<2x8x8xi32>
    %35 = arith.cmpi sle, %34, %33 : vector<2x8x8xi32>
    %cst_12 = arith.constant 0.000000e+00 : f32
    %36 = vector.broadcast %cst_12 : f32 to vector<16x32xf32>
    %37 = vector.extract_strided_slice %28 {offsets = [0, 0, 0], sizes = [2, 8, 8], strides = [1, 1, 1]} : vector<2x8x32xf32> to vector<2x8x8xf32>
    %38 = vector.extract_strided_slice %30 {offsets = [0, 0, 0], sizes = [2, 8, 8], strides = [1, 1, 1]} : vector<2x8x32xf32> to vector<2x8x8xf32>
    %39 = vector.extract_strided_slice %32 {offsets = [0, 0, 0], sizes = [2, 8, 8], strides = [1, 1, 1]} : vector<2x8x32xf32> to vector<2x8x8xf32>
    "tpu.trace_start"() <{level = 10 : i32, message = "bqd,bkd->bqk"}> : () -> ()
    %cst_13 = arith.constant dense<0.000000e+00> : vector<2x8x8xf32>
    %40 = tpu.matmul %37, %38, %cst_13 {dimension_numbers = #tpu.dot_dimension_numbers<[2], [2], [1], [1], [0, 0, 0, 1, 1, 1], [0], [0]>} : vector<2x8x8xf32>, vector<2x8x8xf32>, vector<2x8x8xf32> -> vector<2x8x8xf32>
    %cst_14 = arith.constant -1.000000e+30 : f32
    "tpu.trace_stop"() : () -> ()
    %41 = vector.broadcast %cst_14 : f32 to vector<2x8x8xf32>
    %42 = arith.select %35, %40, %41 : vector<2x8x8xi1>, vector<2x8x8xf32>
    %cst_15 = arith.constant dense<0xFF800000> : vector<2x8xf32>
    %43 = vector.multi_reduction <maximumf>, %42, %cst_15 [2] : vector<2x8x8xf32> to vector<2x8xf32>
    %44 = vector.shape_cast %43 : vector<2x8xf32> to vector<2x8x1xf32>
    %45 = vector.broadcast %44 : vector<2x8x1xf32> to vector<2x8x8xf32>
    %46 = arith.subf %42, %45 : vector<2x8x8xf32>
    %47 = math.exp %46 : vector<2x8x8xf32>
    %cst_16 = arith.constant dense<0.000000e+00> : vector<2x8xf32>
    %48 = vector.multi_reduction <add>, %47, %cst_16 [2] : vector<2x8x8xf32> to vector<2x8xf32>
    %49 = vector.shape_cast %48 : vector<2x8xf32> to vector<2x8x1xf32>
    %50 = tpu.reciprocal %49 {approx = true} : vector<2x8x1xf32> -> vector<2x8x1xf32>
    %51 = vector.broadcast %50 : vector<2x8x1xf32> to vector<2x8x8xf32>
    %52 = arith.mulf %47, %51 : vector<2x8x8xf32>
    "tpu.trace_start"() <{level = 10 : i32, message = "bqk,bkd->bqd"}> : () -> ()
    %cst_17 = arith.constant dense<0.000000e+00> : vector<2x8x8xf32>
    %53 = tpu.matmul %52, %39, %cst_17 {dimension_numbers = #tpu.dot_dimension_numbers<[2], [1], [1], [2], [0, 0, 0, 1, 1, 2], [0], [0]>} : vector<2x8x8xf32>, vector<2x8x8xf32>, vector<2x8x8xf32> -> vector<2x8x8xf32>
    "tpu.trace_stop"() : () -> ()
    %54 = vector.shape_cast %53 : vector<2x8x8xf32> to vector<16x8xf32>
    %c0_18 = arith.constant 0 : index
    %c0_19 = arith.constant 0 : index
    %55 = vector.load %arg3[%c0_18, %c0_19] : memref<32x32xf32, #tpu.memory_space<vmem>>, vector<8x32xf32>
    %cst_20 = arith.constant dense<0.000000e+00> : vector<16x32xf32>
    %56 = tpu.matmul %54, %55, %cst_20 {dimension_numbers = #tpu.dot_dimension_numbers<[1], [0], [0], [1], [0, 0, 1, 1], [], []>} : vector<16x8xf32>, vector<8x32xf32>, vector<16x32xf32> -> vector<16x32xf32>
    %57 = arith.addf %36, %56 : vector<16x32xf32>
    %58 = vector.extract_strided_slice %28 {offsets = [0, 0, 8], sizes = [2, 8, 8], strides = [1, 1, 1]} : vector<2x8x32xf32> to vector<2x8x8xf32>
    %59 = vector.extract_strided_slice %30 {offsets = [0, 0, 8], sizes = [2, 8, 8], strides = [1, 1, 1]} : vector<2x8x32xf32> to vector<2x8x8xf32>
    %60 = vector.extract_strided_slice %32 {offsets = [0, 0, 8], sizes = [2, 8, 8], strides = [1, 1, 1]} : vector<2x8x32xf32> to vector<2x8x8xf32>
    "tpu.trace_start"() <{level = 10 : i32, message = "bqd,bkd->bqk"}> : () -> ()
    %cst_21 = arith.constant dense<0.000000e+00> : vector<2x8x8xf32>
    %61 = tpu.matmul %58, %59, %cst_21 {dimension_numbers = #tpu.dot_dimension_numbers<[2], [2], [1], [1], [0, 0, 0, 1, 1, 1], [0], [0]>} : vector<2x8x8xf32>, vector<2x8x8xf32>, vector<2x8x8xf32> -> vector<2x8x8xf32>
    %cst_22 = arith.constant -1.000000e+30 : f32
    "tpu.trace_stop"() : () -> ()
    %62 = vector.broadcast %cst_22 : f32 to vector<2x8x8xf32>
    %63 = arith.select %35, %61, %62 : vector<2x8x8xi1>, vector<2x8x8xf32>
    %cst_23 = arith.constant dense<0xFF800000> : vector<2x8xf32>
    %64 = vector.multi_reduction <maximumf>, %63, %cst_23 [2] : vector<2x8x8xf32> to vector<2x8xf32>
    %65 = vector.shape_cast %64 : vector<2x8xf32> to vector<2x8x1xf32>
    %66 = vector.broadcast %65 : vector<2x8x1xf32> to vector<2x8x8xf32>
    %67 = arith.subf %63, %66 : vector<2x8x8xf32>
    %68 = math.exp %67 : vector<2x8x8xf32>
    %cst_24 = arith.constant dense<0.000000e+00> : vector<2x8xf32>
    %69 = vector.multi_reduction <add>, %68, %cst_24 [2] : vector<2x8x8xf32> to vector<2x8xf32>
    %70 = vector.shape_cast %69 : vector<2x8xf32> to vector<2x8x1xf32>
    %71 = tpu.reciprocal %70 {approx = true} : vector<2x8x1xf32> -> vector<2x8x1xf32>
    %72 = vector.broadcast %71 : vector<2x8x1xf32> to vector<2x8x8xf32>
    %73 = arith.mulf %68, %72 : vector<2x8x8xf32>
    "tpu.trace_start"() <{level = 10 : i32, message = "bqk,bkd->bqd"}> : () -> ()
    %cst_25 = arith.constant dense<0.000000e+00> : vector<2x8x8xf32>
    %74 = tpu.matmul %73, %60, %cst_25 {dimension_numbers = #tpu.dot_dimension_numbers<[2], [1], [1], [2], [0, 0, 0, 1, 1, 2], [0], [0]>} : vector<2x8x8xf32>, vector<2x8x8xf32>, vector<2x8x8xf32> -> vector<2x8x8xf32>
    "tpu.trace_stop"() : () -> ()
    %75 = vector.shape_cast %74 : vector<2x8x8xf32> to vector<16x8xf32>
    %c8 = arith.constant 8 : index
    %c0_26 = arith.constant 0 : index
    %76 = vector.load %arg3[%c8, %c0_26] : memref<32x32xf32, #tpu.memory_space<vmem>>, vector<8x32xf32>
    %cst_27 = arith.constant dense<0.000000e+00> : vector<16x32xf32>
    %77 = tpu.matmul %75, %76, %cst_27 {dimension_numbers = #tpu.dot_dimension_numbers<[1], [0], [0], [1], [0, 0, 1, 1], [], []>} : vector<16x8xf32>, vector<8x32xf32>, vector<16x32xf32> -> vector<16x32xf32>
    %78 = arith.addf %57, %77 : vector<16x32xf32>
    %79 = vector.extract_strided_slice %28 {offsets = [0, 0, 16], sizes = [2, 8, 8], strides = [1, 1, 1]} : vector<2x8x32xf32> to vector<2x8x8xf32>
    %80 = vector.extract_strided_slice %30 {offsets = [0, 0, 16], sizes = [2, 8, 8], strides = [1, 1, 1]} : vector<2x8x32xf32> to vector<2x8x8xf32>
    %81 = vector.extract_strided_slice %32 {offsets = [0, 0, 16], sizes = [2, 8, 8], strides = [1, 1, 1]} : vector<2x8x32xf32> to vector<2x8x8xf32>
    "tpu.trace_start"() <{level = 10 : i32, message = "bqd,bkd->bqk"}> : () -> ()
    %cst_28 = arith.constant dense<0.000000e+00> : vector<2x8x8xf32>
    %82 = tpu.matmul %79, %80, %cst_28 {dimension_numbers = #tpu.dot_dimension_numbers<[2], [2], [1], [1], [0, 0, 0, 1, 1, 1], [0], [0]>} : vector<2x8x8xf32>, vector<2x8x8xf32>, vector<2x8x8xf32> -> vector<2x8x8xf32>
    %cst_29 = arith.constant -1.000000e+30 : f32
    "tpu.trace_stop"() : () -> ()
    %83 = vector.broadcast %cst_29 : f32 to vector<2x8x8xf32>
    %84 = arith.select %35, %82, %83 : vector<2x8x8xi1>, vector<2x8x8xf32>
    %cst_30 = arith.constant dense<0xFF800000> : vector<2x8xf32>
    %85 = vector.multi_reduction <maximumf>, %84, %cst_30 [2] : vector<2x8x8xf32> to vector<2x8xf32>
    %86 = vector.shape_cast %85 : vector<2x8xf32> to vector<2x8x1xf32>
    %87 = vector.broadcast %86 : vector<2x8x1xf32> to vector<2x8x8xf32>
    %88 = arith.subf %84, %87 : vector<2x8x8xf32>
    %89 = math.exp %88 : vector<2x8x8xf32>
    %cst_31 = arith.constant dense<0.000000e+00> : vector<2x8xf32>
    %90 = vector.multi_reduction <add>, %89, %cst_31 [2] : vector<2x8x8xf32> to vector<2x8xf32>
    %91 = vector.shape_cast %90 : vector<2x8xf32> to vector<2x8x1xf32>
    %92 = tpu.reciprocal %91 {approx = true} : vector<2x8x1xf32> -> vector<2x8x1xf32>
    %93 = vector.broadcast %92 : vector<2x8x1xf32> to vector<2x8x8xf32>
    %94 = arith.mulf %89, %93 : vector<2x8x8xf32>
    "tpu.trace_start"() <{level = 10 : i32, message = "bqk,bkd->bqd"}> : () -> ()
    %cst_32 = arith.constant dense<0.000000e+00> : vector<2x8x8xf32>
    %95 = tpu.matmul %94, %81, %cst_32 {dimension_numbers = #tpu.dot_dimension_numbers<[2], [1], [1], [2], [0, 0, 0, 1, 1, 2], [0], [0]>} : vector<2x8x8xf32>, vector<2x8x8xf32>, vector<2x8x8xf32> -> vector<2x8x8xf32>
    "tpu.trace_stop"() : () -> ()
    %96 = vector.shape_cast %95 : vector<2x8x8xf32> to vector<16x8xf32>
    %c16 = arith.constant 16 : index
    %c0_33 = arith.constant 0 : index
    %97 = vector.load %arg3[%c16, %c0_33] : memref<32x32xf32, #tpu.memory_space<vmem>>, vector<8x32xf32>
    %cst_34 = arith.constant dense<0.000000e+00> : vector<16x32xf32>
    %98 = tpu.matmul %96, %97, %cst_34 {dimension_numbers = #tpu.dot_dimension_numbers<[1], [0], [0], [1], [0, 0, 1, 1], [], []>} : vector<16x8xf32>, vector<8x32xf32>, vector<16x32xf32> -> vector<16x32xf32>
    %99 = arith.addf %78, %98 : vector<16x32xf32>
    %100 = vector.extract_strided_slice %28 {offsets = [0, 0, 24], sizes = [2, 8, 8], strides = [1, 1, 1]} : vector<2x8x32xf32> to vector<2x8x8xf32>
    %101 = vector.extract_strided_slice %30 {offsets = [0, 0, 24], sizes = [2, 8, 8], strides = [1, 1, 1]} : vector<2x8x32xf32> to vector<2x8x8xf32>
    %102 = vector.extract_strided_slice %32 {offsets = [0, 0, 24], sizes = [2, 8, 8], strides = [1, 1, 1]} : vector<2x8x32xf32> to vector<2x8x8xf32>
    "tpu.trace_start"() <{level = 10 : i32, message = "bqd,bkd->bqk"}> : () -> ()
    %cst_35 = arith.constant dense<0.000000e+00> : vector<2x8x8xf32>
    %103 = tpu.matmul %100, %101, %cst_35 {dimension_numbers = #tpu.dot_dimension_numbers<[2], [2], [1], [1], [0, 0, 0, 1, 1, 1], [0], [0]>} : vector<2x8x8xf32>, vector<2x8x8xf32>, vector<2x8x8xf32> -> vector<2x8x8xf32>
    %cst_36 = arith.constant -1.000000e+30 : f32
    "tpu.trace_stop"() : () -> ()
    %104 = vector.broadcast %cst_36 : f32 to vector<2x8x8xf32>
    %105 = arith.select %35, %103, %104 : vector<2x8x8xi1>, vector<2x8x8xf32>
    %cst_37 = arith.constant dense<0xFF800000> : vector<2x8xf32>
    %106 = vector.multi_reduction <maximumf>, %105, %cst_37 [2] : vector<2x8x8xf32> to vector<2x8xf32>
    %107 = vector.shape_cast %106 : vector<2x8xf32> to vector<2x8x1xf32>
    %108 = vector.broadcast %107 : vector<2x8x1xf32> to vector<2x8x8xf32>
    %109 = arith.subf %105, %108 : vector<2x8x8xf32>
    %110 = math.exp %109 : vector<2x8x8xf32>
    %cst_38 = arith.constant dense<0.000000e+00> : vector<2x8xf32>
    %111 = vector.multi_reduction <add>, %110, %cst_38 [2] : vector<2x8x8xf32> to vector<2x8xf32>
    %112 = vector.shape_cast %111 : vector<2x8xf32> to vector<2x8x1xf32>
    %113 = tpu.reciprocal %112 {approx = true} : vector<2x8x1xf32> -> vector<2x8x1xf32>
    %114 = vector.broadcast %113 : vector<2x8x1xf32> to vector<2x8x8xf32>
    %115 = arith.mulf %110, %114 : vector<2x8x8xf32>
    "tpu.trace_start"() <{level = 10 : i32, message = "bqk,bkd->bqd"}> : () -> ()
    %cst_39 = arith.constant dense<0.000000e+00> : vector<2x8x8xf32>
    %116 = tpu.matmul %115, %102, %cst_39 {dimension_numbers = #tpu.dot_dimension_numbers<[2], [1], [1], [2], [0, 0, 0, 1, 1, 2], [0], [0]>} : vector<2x8x8xf32>, vector<2x8x8xf32>, vector<2x8x8xf32> -> vector<2x8x8xf32>
    "tpu.trace_stop"() : () -> ()
    %117 = vector.shape_cast %116 : vector<2x8x8xf32> to vector<16x8xf32>
    %c24 = arith.constant 24 : index
    %c0_40 = arith.constant 0 : index
    %118 = vector.load %arg3[%c24, %c0_40] : memref<32x32xf32, #tpu.memory_space<vmem>>, vector<8x32xf32>
    %cst_41 = arith.constant dense<0.000000e+00> : vector<16x32xf32>
    %119 = tpu.matmul %117, %118, %cst_41 {dimension_numbers = #tpu.dot_dimension_numbers<[1], [0], [0], [1], [0, 0, 1, 1], [], []>} : vector<16x8xf32>, vector<8x32xf32>, vector<16x32xf32> -> vector<16x32xf32>
    %120 = arith.addf %99, %119 : vector<16x32xf32>
    %121 = arith.addf %0, %120 : vector<16x32xf32>
    %c0_42 = arith.constant 0 : index
    %c0_43 = arith.constant 0 : index
    %122 = vector.load %arg6[%c0_42, %c0_43] : memref<1x32xf32, #tpu.memory_space<vmem>>, vector<1x32xf32>
    %c0_44 = arith.constant 0 : index
    %c0_45 = arith.constant 0 : index
    %123 = vector.load %arg7[%c0_44, %c0_45] : memref<1x32xf32, #tpu.memory_space<vmem>>, vector<1x32xf32>
    %cst_46 = arith.constant dense<0.000000e+00> : vector<16xf32>
    %124 = vector.multi_reduction <add>, %121, %cst_46 [1] : vector<16x32xf32> to vector<16xf32>
    %125 = vector.shape_cast %124 : vector<16xf32> to vector<16x1xf32>
    %cst_47 = arith.constant 3.200000e+01 : f32
    %126 = vector.broadcast %cst_47 : f32 to vector<16x1xf32>
    %127 = arith.divf %125, %126 : vector<16x1xf32>
    %128 = vector.broadcast %127 : vector<16x1xf32> to vector<16x32xf32>
    %129 = arith.subf %121, %128 : vector<16x32xf32>
    %130 = arith.mulf %129, %129 : vector<16x32xf32>
    %cst_48 = arith.constant dense<0.000000e+00> : vector<16xf32>
    %131 = vector.multi_reduction <add>, %130, %cst_48 [1] : vector<16x32xf32> to vector<16xf32>
    %132 = vector.shape_cast %131 : vector<16xf32> to vector<16x1xf32>
    %cst_49 = arith.constant 3.200000e+01 : f32
    %133 = vector.broadcast %cst_49 : f32 to vector<16x1xf32>
    %134 = arith.divf %132, %133 : vector<16x1xf32>
    %135 = vector.broadcast %127 : vector<16x1xf32> to vector<16x32xf32>
    %136 = arith.subf %121, %135 : vector<16x32xf32>
    %cst_50 = arith.constant 9.99999974E-6 : f32
    %137 = vector.broadcast %cst_50 : f32 to vector<16x1xf32>
    %138 = arith.addf %134, %137 : vector<16x1xf32>
    %139 = math.rsqrt %138 : vector<16x1xf32>
    %140 = vector.broadcast %139 : vector<16x1xf32> to vector<16x32xf32>
    %141 = arith.mulf %136, %140 : vector<16x32xf32>
    %142 = vector.broadcast %122 : vector<1x32xf32> to vector<16x32xf32>
    %143 = arith.mulf %141, %142 : vector<16x32xf32>
    %144 = vector.broadcast %123 : vector<1x32xf32> to vector<16x32xf32>
    %145 = arith.addf %143, %144 : vector<16x32xf32>
    %c0_51 = arith.constant 0 : index
    %c0_52 = arith.constant 0 : index
    %146 = vector.load %arg8[%c0_51, %c0_52] : memref<32x32xf32, #tpu.memory_space<vmem>>, vector<32x32xf32>
    %cst_53 = arith.constant dense<0.000000e+00> : vector<16x32xf32>
    %147 = tpu.matmul %145, %146, %cst_53 {dimension_numbers = #tpu.dot_dimension_numbers<[1], [0], [0], [1], [0, 0, 1, 1], [], []>} : vector<16x32xf32>, vector<32x32xf32>, vector<16x32xf32> -> vector<16x32xf32>
    %c0_54 = arith.constant 0 : index
    %c0_55 = arith.constant 0 : index
    %148 = vector.load %arg9[%c0_54, %c0_55] : memref<1x32xf32, #tpu.memory_space<vmem>>, vector<1x32xf32>
    %149 = vector.broadcast %148 : vector<1x32xf32> to vector<16x32xf32>
    %150 = arith.addf %147, %149 : vector<16x32xf32>
    %cst_56 = arith.constant 0.000000e+00 : f32
    %151 = vector.broadcast %cst_56 : f32 to vector<16x32xf32>
    %152 = arith.maximumf %150, %151 : vector<16x32xf32>
    %c0_57 = arith.constant 0 : index
    %c0_58 = arith.constant 0 : index
    %153 = vector.load %arg10[%c0_57, %c0_58] : memref<32x32xf32, #tpu.memory_space<vmem>>, vector<32x32xf32>
    %cst_59 = arith.constant dense<0.000000e+00> : vector<16x32xf32>
    %154 = tpu.matmul %152, %153, %cst_59 {dimension_numbers = #tpu.dot_dimension_numbers<[1], [0], [0], [1], [0, 0, 1, 1], [], []>} : vector<16x32xf32>, vector<32x32xf32>, vector<16x32xf32> -> vector<16x32xf32>
    %c0_60 = arith.constant 0 : index
    %c0_61 = arith.constant 0 : index
    %155 = vector.load %arg11[%c0_60, %c0_61] : memref<1x32xf32, #tpu.memory_space<vmem>>, vector<1x32xf32>
    %156 = vector.broadcast %155 : vector<1x32xf32> to vector<16x32xf32>
    %157 = arith.addf %154, %156 : vector<16x32xf32>
    %158 = arith.addf %121, %157 : vector<16x32xf32>
    %c0_62 = arith.constant 0 : index
    %c0_63 = arith.constant 0 : index
    %159 = vector.load %arg12[%c0_62, %c0_63] : memref<16x32xf32, #tpu.memory_space<vmem>>, vector<16x32xf32>
    tpu.vector_store %arg12[%c0_62, %c0_63], %158 {strides = array<i32>} : memref<16x32xf32, #tpu.memory_space<vmem>>, vector<16x32xf32>,
    return
  }
  func.func @transform_0(%arg0: i32) -> (i32, i32) {
    %c0_i32 = arith.constant 0 : i32
    %c0_i32_0 = arith.constant 0 : i32
    %c0_i32_1 = arith.constant 0 : i32
    return %c0_i32, %c0_i32_0 : i32, i32
  }
  func.func @transform_1(%arg0: i32) -> (i32, i32) {
    %c0_i32 = arith.constant 0 : i32
    %c0_i32_0 = arith.constant 0 : i32
    %c0_i32_1 = arith.constant 0 : i32
    return %c0_i32, %c0_i32_0 : i32, i32
  }
  func.func @transform_2(%arg0: i32) -> (i32, i32) {
    %c0_i32 = arith.constant 0 : i32
    %c0_i32_0 = arith.constant 0 : i32
    %c0_i32_1 = arith.constant 0 : i32
    return %c0_i32, %c0_i32_0 : i32, i32
  }
  func.func @transform_3(%arg0: i32) -> (i32, i32) {
    %c0_i32 = arith.constant 0 : i32
    %c0_i32_0 = arith.constant 0 : i32
    %c0_i32_1 = arith.constant 0 : i32
    return %c0_i32, %c0_i32_0 : i32, i32
  }
  func.func @transform_4(%arg0: i32) -> (i32, i32) {
    %c0_i32 = arith.constant 0 : i32
    %c0_i32_0 = arith.constant 0 : i32
    %c0_i32_1 = arith.constant 0 : i32
    return %c0_i32, %c0_i32_0 : i32, i32
  }
  func.func @transform_5(%arg0: i32) -> (i32, i32) {
    %c0_i32 = arith.constant 0 : i32
    %c0_i32_0 = arith.constant 0 : i32
    %c0_i32_1 = arith.constant 0 : i32
    return %c0_i32, %c0_i32_0 : i32, i32
  }
  func.func @transform_6(%arg0: i32) -> (i32, i32) {
    %c0_i32 = arith.constant 0 : i32
    %c0_i32_0 = arith.constant 0 : i32
    %c0_i32_1 = arith.constant 0 : i32
    return %c0_i32, %c0_i32_0 : i32, i32
  }
  func.func @transform_7(%arg0: i32) -> (i32, i32) {
    %c0_i32 = arith.constant 0 : i32
    %c0_i32_0 = arith.constant 0 : i32
    %c0_i32_1 = arith.constant 0 : i32
    return %c0_i32, %c0_i32_0 : i32, i32
  }
  func.func @transform_8(%arg0: i32) -> (i32, i32) {
    %c0_i32 = arith.constant 0 : i32
    %c0_i32_0 = arith.constant 0 : i32
    %c0_i32_1 = arith.constant 0 : i32
    return %c0_i32, %c0_i32_0 : i32, i32
  }
  func.func @transform_9(%arg0: i32) -> (i32, i32) {
    %c0_i32 = arith.constant 0 : i32
    %c0_i32_0 = arith.constant 0 : i32
    %c0_i32_1 = arith.constant 0 : i32
    return %c0_i32, %c0_i32_0 : i32, i32
  }
  func.func @transform_10(%arg0: i32) -> (i32, i32) {
    %c0_i32 = arith.constant 0 : i32
    %c0_i32_0 = arith.constant 0 : i32
    %c0_i32_1 = arith.constant 0 : i32
    return %c0_i32, %c0_i32_0 : i32, i32
  }
  func.func @transform_11(%arg0: i32) -> (i32, i32) {
    %c0_i32 = arith.constant 0 : i32
    %c0_i32_0 = arith.constant 0 : i32
    %c0_i32_1 = arith.constant 0 : i32
    return %c0_i32, %c0_i32_0 : i32, i32
  }
}

</mosaic_0001>

<bundles_post_ra>
// kernel: tpu_custom_call.1
= control target key start
LH: loop header
LB: loop body
LE: loop exit
PB: predicated region body
PF: predicated region fallthrough
CT: control target
= control target key end

     0   :  { %16 = vsyncpa [#allocation3], 0  ;;  %s3123_s0 = inlined_call_operand.hbm [shape: f32[16,32], index: 0, kind: input, shape index: {}]   ;;  %s3124_s1 = inlined_call_operand.hbm [shape: f32[32,96], index: 1, kind: input, shape index: {}]   ;;  %s3125_s2 = inlined_call_operand.hbm [shape: f32[32,32], index: 2, kind: input, shape index: {}]   ;;  %s3126_s3 = inlined_call_operand.vmem [shape: f32[1,32], index: 3, kind: input, shape index: {}]   ;;  %s3127_s4 = inlined_call_operand.vmem [shape: f32[1,32], index: 4, kind: input, shape index: {}]   ;;  %s3128_s5 = inlined_call_operand.hbm [shape: f32[1,32], index: 5, kind: input, shape index: {}]   ;;  %s3129_s6 = inlined_call_operand.hbm [shape: f32[1,32], index: 6, kind: input, shape index: {}]   ;;  %s3130_s7 = inlined_call_operand.hbm [shape: f32[32,32], index: 7, kind: input, shape index: {}]   ;;  %s3131_s8 = inlined_call_operand.hbm [shape: f32[1,32], index: 8, kind: input, shape index: {}]   ;;  %s3132_s9 = inlined_call_operand.vmem [shape: f32[32,32], index: 9, kind: input, shape index: {}]   ;;  %s3133_s10 = inlined_call_operand.vmem [shape: f32[1,32], index: 10, kind: input, shape index: {}]   ;;  %s3134_s11 = inlined_call_operand.hbm [shape: f32[16,32], index: 11, kind: output, shape index: {}]  }
   0x1   :  { %17 = vsyncpa [#allocation6], 0 }
   0x2   :  { %18 = vsyncpa [#allocation9], 0 }
   0x3   :  { %19 = vsyncpa [#allocation12], 0 }
   0x4   :  { %20 = vsyncpa [#allocation4], 0  ;;  %s2699_s17 = smov [#allocation5]   ;;  %s2700_s19 = smov [#allocation8]  }
   0x5   :  { %s38_s18 = sshll.u32 %s2699_s17, 4  ;;  %s67_s20 = sshll.u32 %s2700_s19, 4  ;;  %s39_s18 = int_to_ptr.vmem [resolvable:$true] %s38_s18  ;;  %s2782_s20 = int_to_ptr.vmem [resolvable:$true] %s67_s20 }
   0x6   :  { %s2513_s23 = scalar_lea.hbm %s3124_s1, 512 }
   0x7   :  { %p2514_p0 = scmp.ne.s32.totalorder %s3124_s1, %s2513_s23  ;;  %p2517_p1 = scmp.lt.u32.totalorder %s2513_s23, %s3124_s1 }
   0x9   :  { %p2519_p2 = pnand %p2517_p1, %p2514_p0 }
   0xb   :  { %2522 = shalt.err (!%p2519_p2)
}
   0xc   :  { %s2523_s28 = scalar_lea.vmem %s39_s18, 512  ;;  %p2528_p4 = scmp.lt.s32.totalorder %s39_s18, %s39_s18 }
   0xd   :  { %p2524_p3 = scmp.ne.s32.totalorder %s39_s18, %s2523_s28  ;;  %p2529_p5 = scmp.lt.s32.totalorder %s2523_s28, %s2523_s28 }
   0xf   :  { %p2530_p6 = por %p2529_p5, %p2528_p4 }
  0x11   :  { %p2531_p7 = pnand %p2530_p6, %p2524_p3 }
  0x13   :  { %2534 = shalt.err (!%p2531_p7)
}
  0x14   :  { %s2701_s29 = smov 128   ;;  %s2702_s30 = smov 8  }
  0x15   :  { %44 = dma.hbm_to_vmem [thread:$0]  %s3124_s1, 512, %s39_s18, [#allocation6], %s2701_s29, %s2701_s29, %s2702_s30  }
  0x16   :  { %s2535_s16 = scalar_lea.hbm %s3128_s5, 16 }
  0x17   :  { %p2536_p8 = scmp.ne.s32.totalorder %s3128_s5, %s2535_s16  ;;  %p2539_p9 = scmp.lt.u32.totalorder %s2535_s16, %s3128_s5 }
  0x19   :  { %p2541_p10 = pnand %p2539_p9, %p2536_p8 }
  0x1b   :  { %2544 = shalt.err (!%p2541_p10)
}
  0x1c   :  { %s2545_s23 = scalar_lea.vmem %s2782_s20, 16  ;;  %s2549_s1 = scalar_lea.vmem %s2782_s20, 32 }
  0x1d   :  { %p2546_p11 = scmp.ne.s32.totalorder %s2782_s20, %s2545_s23  ;;  %p2550_p12 = scmp.lt.s32.totalorder %s2782_s20, %s2782_s20 }
  0x1e   :  { %p2551_p13 = scmp.lt.s32.totalorder %s2549_s1, %s2545_s23 }
  0x20   :  { %p2552_p0 = por %p2551_p13, %p2550_p12 }
  0x22   :  { %p2553_p1 = pnand %p2552_p0, %p2546_p11 }
  0x24   :  { %2556 = shalt.err (!%p2553_p1)
}
  0x25   :  { %70 = dma.hbm_to_vmem [thread:$0]  %s3128_s5, 16, %s2782_s20, [#allocation9]  }
  0x26   :  { %s2703_s25 = smov [#allocation11]   ;;  %s2704_s27 = smov [#allocation2]  }
  0x27   :  { %s86_s26 = sshll.u32 %s2703_s25, 4  ;;  %s26_s28 = sshll.u32 %s2704_s27, 4  ;;  %s87_s26 = int_to_ptr.vmem [resolvable:$true] %s86_s26  ;;  %s2817_s28 = int_to_ptr.vmem [resolvable:$true] %s26_s28 }
  0x28   :  { %s2557_s14 = scalar_lea.hbm %s3130_s7, 512 }
  0x29   :  { %p2558_p2 = scmp.ne.s32.totalorder %s3130_s7, %s2557_s14  ;;  %p2561_p3 = scmp.lt.u32.totalorder %s2557_s14, %s3130_s7 }
  0x2b   :  { %p2563_p4 = pnand %p2561_p3, %p2558_p2 }
  0x2d   :  { %2566 = shalt.err (!%p2563_p4)
}
  0x2e   :  { %s2567_s5 = scalar_lea.vmem %s87_s26, 512  ;;  %p2572_p6 = scmp.lt.s32.totalorder %s87_s26, %s87_s26 }
  0x2f   :  { %p2568_p5 = scmp.ne.s32.totalorder %s87_s26, %s2567_s5  ;;  %p2573_p7 = scmp.lt.s32.totalorder %s2567_s5, %s2567_s5 }
  0x31   :  { %p2574_p8 = por %p2573_p7, %p2572_p6 }
  0x33   :  { %p2575_p9 = pnand %p2574_p8, %p2568_p5 }
  0x35   :  { %2578 = shalt.err (!%p2575_p9)
}
  0x36   :  { %92 = dma.hbm_to_vmem [thread:$0]  %s3130_s7, 512, %s87_s26, [#allocation12], %s2701_s29, %s2701_s29, %s2702_s30  }
  0x37   :  { %s2579_s1 = scalar_lea.hbm %s3123_s0, 256 }
  0x38   :  { %p2580_p10 = scmp.ne.s32.totalorder %s3123_s0, %s2579_s1  ;;  %p2583_p11 = scmp.lt.u32.totalorder %s2579_s1, %s3123_s0 }
  0x3a   :  { %p2585_p12 = pnand %p2583_p11, %p2580_p10 }
  0x3c   :  { %2588 = shalt.err (!%p2585_p12)
}
  0x3d   :  { %s2589_s12 = scalar_lea.vmem %s2817_s28, 256  ;;  %p2594_p0 = scmp.lt.s32.totalorder %s2817_s28, %s2817_s28 }
  0x3e   :  { %p2590_p13 = scmp.ne.s32.totalorder %s2817_s28, %s2589_s12  ;;  %p2595_p1 = scmp.lt.s32.totalorder %s2589_s12, %s2589_s12 }
  0x40   :  { %p2596_p2 = por %p2595_p1, %p2594_p0 }
  0x42   :  { %p2597_p3 = pnand %p2596_p2, %p2590_p13 }
  0x44   :  { %2600 = shalt.err (!%p2597_p3)
}
  0x45   :  { %32 = dma.hbm_to_vmem [thread:$0]  %s3123_s0, 256, %s2817_s28, [#allocation3], %s2701_s29, %s2701_s29, %s2702_s30  }
  0x46   :  { %s2705_s13 = smov [#allocation7]   ;;  %s2706_s15 = smov [#allocation10]  }
  0x47   :  { %s50_s14 = sshll.u32 %s2705_s13, 4  ;;  %s77_s16 = sshll.u32 %s2706_s15, 4  ;;  %s51_s14 = int_to_ptr.vmem [resolvable:$true] %s50_s14  ;;  %s78_s16 = int_to_ptr.vmem [resolvable:$true] %s77_s16 }
  0x48   :  { %s2601_s5 = scalar_lea.hbm %s3125_s2, 512 }
  0x49   :  { %p2602_p4 = scmp.ne.s32.totalorder %s3125_s2, %s2601_s5  ;;  %p2605_p5 = scmp.lt.u32.totalorder %s2601_s5, %s3125_s2 }
  0x4b   :  { %p2607_p6 = pnand %p2605_p5, %p2602_p4 }
  0x4d   :  { %2610 = shalt.err (!%p2607_p6)
}
  0x4e   :  { %s2611_s0 = scalar_lea.vmem %s51_s14, 512  ;;  %p2616_p8 = scmp.lt.s32.totalorder %s51_s14, %s51_s14 }
  0x4f   :  { %p2612_p7 = scmp.ne.s32.totalorder %s51_s14, %s2611_s0  ;;  %p2617_p9 = scmp.lt.s32.totalorder %s2611_s0, %s2611_s0 }
  0x51   :  { %p2618_p10 = por %p2617_p9, %p2616_p8 }
  0x53   :  { %p2619_p11 = pnand %p2618_p10, %p2612_p7 }
  0x55   :  { %2622 = shalt.err (!%p2619_p11)
}
  0x56   :  { %56 = dma.hbm_to_vmem [thread:$0]  %s3125_s2, 512, %s51_s14, [#allocation6], %s2701_s29, %s2701_s29, %s2702_s30  }
  0x57   :  { %s2623_s25 = scalar_lea.hbm %s3129_s6, 16 }
  0x58   :  { %p2624_p12 = scmp.ne.s32.totalorder %s3129_s6, %s2623_s25  ;;  %p2627_p13 = scmp.lt.u32.totalorder %s2623_s25, %s3129_s6 }
  0x5a   :  { %p2629_p0 = pnand %p2627_p13, %p2624_p12 }
  0x5c   :  { %2632 = shalt.err (!%p2629_p0)
}
  0x5d   :  { %s2633_s13 = scalar_lea.vmem %s78_s16, 16  ;;  %s2637_s15 = scalar_lea.vmem %s78_s16, 32 }
  0x5e   :  { %p2634_p1 = scmp.ne.s32.totalorder %s78_s16, %s2633_s13  ;;  %p2638_p2 = scmp.lt.s32.totalorder %s78_s16, %s78_s16 }
  0x5f   :  { %p2639_p3 = scmp.lt.s32.totalorder %s2637_s15, %s2633_s13 }
  0x61   :  { %p2640_p4 = por %p2639_p3, %p2638_p2 }
  0x63   :  { %p2641_p5 = pnand %p2640_p4, %p2634_p1 }
  0x65   :  { %2644 = shalt.err (!%p2641_p5)
}
  0x66   :  { %80 = dma.hbm_to_vmem [thread:$0]  %s3129_s6, 16, %s78_s16, [#allocation9]  }
  0x67   :  { %s2707_s17 = smov [#allocation13]   ;;  %s2645_s21 = scalar_lea.hbm %s3131_s8, 16 }
  0x68   :  { %s99_s19 = sshll.u32 %s2707_s17, 4  ;;  %p2646_p6 = scmp.ne.s32.totalorder %s3131_s8, %s2645_s21  ;;  %s100_s19 = int_to_ptr.vmem [resolvable:$true] %s99_s19 }
  0x69   :  { %p2649_p7 = scmp.lt.u32.totalorder %s2645_s21, %s3131_s8 }
  0x6b   :  { %p2651_p8 = pnand %p2649_p7, %p2646_p6 }
  0x6d   :  { %2654 = shalt.err (!%p2651_p8)
}
  0x6e   :  { %s2655_s1 = scalar_lea.vmem %s100_s19, 16  ;;  %s2659_s6 = scalar_lea.vmem %s100_s19, 32 }
  0x6f   :  { %p2656_p9 = scmp.ne.s32.totalorder %s100_s19, %s2655_s1  ;;  %p2660_p10 = scmp.lt.s32.totalorder %s100_s19, %s100_s19 }
  0x70   :  { %p2661_p11 = scmp.lt.s32.totalorder %s2659_s6, %s2655_s1 }
  0x72   :  { %p2662_p12 = por %p2661_p11, %p2660_p10 }
  0x74   :  { %p2663_p13 = pnand %p2662_p12, %p2656_p9 }
  0x76   :  { %2666 = shalt.err (!%p2663_p13)
}
  0x77   :  { %102 = dma.hbm_to_vmem [thread:$0]  %s3131_s8, 16, %s100_s19, [#allocation12]  }
  0x78   :  { %2689 = dma.done.wait [#allocation3], 256  }
  0x79   :  { %2690 = vsyncadd [#allocation3], 4294967040 }
  0x7a   :  { %2691 = dma.done.wait [#allocation6], 1024  }
  0x7b   :  { %2692 = vsyncadd [#allocation6], 4294966272 }
  0x7c   :  { %2693 = dma.done.wait [#allocation9], 32  }
  0x7d   :  { %2694 = vsyncadd [#allocation9], 4294967264 }
  0x7e   :  { %2695 = dma.done.wait [#allocation12], 528  }
  0x7f   :  { %2696 = vsyncadd [#allocation12], 4294966768  ;;  %vm132_vm0 = vcmask 261120   ;;  %v2893_v0 = vld [vmem:[#allocation2] sm:$0xff]  ;;  %v2895_v1 = vld [vmem:[#allocation2 + $0x8] sm:$0xff]  ;;  %v2708_v36 = vmov 0.0   ;;  %v261_v41 = vlaneseq }
  0x80   :  { %v133_v2 = vsel %vm132_vm0, %v2893_v0, 0.0  ;;  %v136_v3 = vsel %vm132_vm0, %v2895_v1, 0.0  ;;  %v176_v14 = vld [vmem:[#allocation5] sm:$0xff]  ;;  %v177_v15 = vld [vmem:[#allocation5 + $0x8] sm:$0xff]  ;;  %v178_v16 = vld [vmem:[#allocation5 + $0x10] sm:$0xff]  ;;  %2298 = vmatprep.subr.mxu1 %v2708_v36  ;;  %vm2709_vm1 = vmmov 0  }
  0x81   :  { %134 = vadd.xlane.f32.xlu0 %v133_v2  ;;  %v2420_v17 = vpack.c.bf16 %v177_v15, %v176_v14  ;;  %v179_v18 = vld [vmem:[#allocation5 + $0x18] sm:$0xff]  ;;  %v2181_v27 = vld [vmem:[%s3126_s3] ss:$0 sm:$0xff]  ;;  %2300 = vmatprep.mubr.msk.f32.mxu1 %vm2709_vm1, %v2708_v36  ;;  %s2710_s3 = smov 96   ;;  %vm269_vm2 = vcmask 64512   ;;  %v262_v42 = vshrl.u32 %v261_v41, 7 }
  0x82   :  { %v2424_v19 = vpack.c.bf16 %v179_v18, %v178_v16  ;;  %v2182_v29 = vld [vmem:[%s3127_s4] ss:$0 sm:$0xff]  ;;  %v264_v43 = vand.u32 127, %v261_v41  ;;  %s2711_s4 = smov 64   ;;  %s2712_s12 = smov 88  }
  0x83   :  { %2421 = vmatprep.subr.bf16.mxu0 %v2420_v17  ;;  %s2713_s7 = smov 120   ;;  %s2714_s26 = smov 80  }
  0x84   :  { %2423 = vmatpush3.bf16.msra.mxu0 %v2420_v17  ;;  %vm2937_vm3 = vcmp.le.s32.totalorder %v264_v43, %v262_v42  ;;  %s2715_s13 = smov 56   ;;  %s2716_s15 = smov 112  }
  0x85   :  { %137 = vadd.xlane.f32.xlu0 %v136_v3  ;;  %2425 = vmatprep.subr.bf16.mxu0 %v2424_v19  ;;  %s2717_s2 = smov 48   ;;  %s2718_s14 = smov 72  }
  0x86   :  { %s2719_s17 = smov 104   ;;  %s2720_s19 = smov 40  }
  0x88   :  { %2427 = vmatpush3.bf16.msra.mxu0 %v2424_v19 }
  0x89   :  { %2318 = vmatprep.subr.mxu0 %v2708_v36 }
 0x10e   :  { %v135_v4 = vpop.xlane.xlu0 %134 }
 0x10f   :  { %v140_v5 = vmul.f32 0.03125, %v135_v4 }
 0x111   :  { %v142_v6 = vsub.f32 %v2893_v0, %v140_v5 }
 0x112   :  { %v138_v7 = vpop.xlane.xlu0 %137 }
 0x113   :  { %v141_v8 = vmul.f32 0.03125, %v138_v7  ;;  %v144_v9 = vmul.f32 %v142_v6, %v142_v6 }
 0x115   :  { %v143_v10 = vsub.f32 %v2895_v1, %v141_v8  ;;  %v146_v11 = vsel %vm132_vm0, %v144_v9, 0.0 }
 0x116   :  { %147 = vadd.xlane.f32.xlu1 %v146_v11 }
 0x117   :  { %v145_v12 = vmul.f32 %v143_v10, %v143_v10 }
 0x119   :  { %v149_v13 = vsel %vm132_vm0, %v145_v12, 0.0 }
 0x11a   :  { %150 = vadd.xlane.f32.xlu1 %v149_v13 }
 0x1a3   :  { %v148_v20 = vpop.xlane.xlu1 %147 }
 0x1a4   :  { %v152_v21 = vmul.f32 0.03125, %v148_v20 }
 0x1a6   :  { %v154_v22 = vadd.f32 1e-05, %v152_v21 }
 0x1a7   :  { %v151_v23 = vpop.xlane.xlu1 %150 }
 0x1a8   :  { %2473 = vrsqrt.f32 %v154_v22  ;;  %v153_v24 = vmul.f32 0.03125, %v151_v23 }
 0x1aa   :  { %v155_v25 = vadd.f32 1e-05, %v153_v24 }
 0x1ac   :  { %2475 = vrsqrt.f32 %v155_v25 }
 0x1b2   :  { %v2474_v26 = vpop.eup %2473 }
 0x1b3   :  { %v158_v28 = vmul.f32 %v2474_v26, %v142_v6 }
 0x1b5   :  { %v166_v30 = vmul.f32 %v2181_v27, %v158_v28 }
 0x1b6   :  { %v2476_v31 = vpop.eup %2475 }
 0x1b7   :  { %v159_v32 = vmul.f32 %v2476_v31, %v143_v10  ;;  %v174_v33 = vadd.f32 %v2182_v29, %v166_v30 }
 0x1b9   :  { %v167_v34 = vmul.f32 %v2181_v27, %v159_v32  ;;  %2295 = vmatprep.mubr.msk.f32.mxu0 %vm132_vm0, %v174_v33 }
 0x1bb   :  { %v175_v35 = vadd.f32 %v2182_v29, %v167_v34 }
 0x1bd   :  { %2296 = vmatmul.mubr.msk.f32.vlgmr.msra.gmra.mrb[0].mxu0 %vm132_vm0, %v175_v35 }
 0x1be   :  { %2320 = vmatprep.mubr.msk.f32.mxu0 %vm2709_vm1, %v2708_v36 }
 0x290   :  { %v2919_v37 = vpop.f32.mrb[0].mxu0 }
 0x291   :  { %345 = vrot.lane.b32.xlu1 %v2919_v37, %s2710_s3  ;;  %v2922_v38 = vpop.f32.mrb[1].mxu0 }
 0x292   :  { %267 = vrot.lane.b32.xlu0 %v2922_v38, %s2710_s3 }
 0x303   :  { %v346_v40 = vpop.permute.xlu1 %345 }
 0x304   :  { %v268_v39 = vpop.permute.xlu0 %267 }
 0x305   :  { %2299 = vmatpush3.xpose.msk.msra.mxu1 %vm269_vm2, %v268_v39 }
 0x306   :  { %2303 = vmatprep.subr.mxu1 %v2708_v36 }
 0x308   :  { %2301 = vmatmul.mubr.msk.f32.vlgmr.msra.gmra.mrb[0].mxu1 %vm269_vm2, %v2922_v38 }
 0x309   :  { %2304 = vmatpush3.xpose.msk.msra.mxu1 %vm269_vm2, %v346_v40  ;;  %2305 = vmatprep.mubr.msk.f32.mxu1 %vm2709_vm1, %v2708_v36 }
 0x30a   :  { %2308 = vmatprep.subr.mxu1 %v2708_v36 }
 0x30c   :  { %2306 = vmatmul.mubr.msk.f32.vlgmr.msra.gmra.mrb[2].mxu1 %vm269_vm2, %v2919_v37 }
 0x30d   :  { %2310 = vmatprep.mubr.msk.f32.mxu1 %vm2709_vm1, %v2708_v36 }
 0x3db   :  { %v340_v45 = vpop.f32.mrb[0].mxu1 }
 0x3dc   :  { %v421_v46 = vsel %vm2937_vm3, %v340_v45, -1e+30  ;;  %v2302_v47 = vpop.f32.mrb[1].mxu1 }
 0x3dd   :  { %v423_v48 = vsel %vm269_vm2, %v421_v46, -inf }
 0x3de   :  { %424 = vmax.xlane.f32.xlu1 %v423_v48 }
 0x3df   :  { %v417_v49 = vpop.f32.mrb[2].mxu1 }
 0x3e0   :  { %v422_v50 = vsel %vm2937_vm3, %v417_v49, -1e+30  ;;  %v2307_v51 = vpop.f32.mrb[3].mxu1 }
 0x3e1   :  { %v426_v52 = vsel %vm269_vm2, %v422_v50, -inf }
 0x3e2   :  { %427 = vmax.xlane.f32.xlu0 %v426_v52 }
 0x3ef   :  { %521 = vrot.lane.b32.xlu1 %v2919_v37, %s2711_s4 }
 0x3f3   :  { %678 = vrot.lane.b32.xlu1 %v2919_v37, %s2712_s12 }
 0x46b   :  { %v425_v53 = vpop.xlane.xlu1 %424 }
 0x46c   :  { %v429_v54 = vsub.f32 %v421_v46, %v425_v53 }
 0x46e   :  { %v431_v55 = vmul.f32 1.442695, %v429_v54 }
 0x46f   :  { %v428_v56 = vpop.xlane.xlu0 %427  ;;  %v522_v63 = vpop.permute.xlu1 %521 }
 0x470   :  { %2477 = vpow2.f32 %v431_v55  ;;  %v430_v57 = vsub.f32 %v422_v50, %v428_v56 }
 0x472   :  { %v433_v58 = vmul.f32 1.442695, %v430_v57 }
 0x473   :  { %v679_v2 = vpop.permute.xlu1 %678 }
 0x474   :  { %2479 = vpow2.f32 %v433_v58 }
 0x47a   :  { %v2478_v59 = vpop.eup %2477 }
 0x47b   :  { %v435_v60 = vsel %vm269_vm2, %v2478_v59, 0.0 }
 0x47c   :  { %436 = vadd.xlane.f32.xlu0 %v435_v60 }
 0x47e   :  { %v2480_v61 = vpop.eup %2479 }
 0x47f   :  { %v438_v62 = vsel %vm269_vm2, %v2480_v61, 0.0 }
 0x480   :  { %439 = vadd.xlane.f32.xlu1 %v438_v62  ;;  %v930_v62 = vld [vmem:[#allocation7 + $0x8] sm:$0xff] }
 0x491   :  { %676 = vrot.lane.b32.xlu1 %v2919_v37, %s2713_s7 }
 0x492   :  { %445 = vrot.lane.b32.xlu0 %v2922_v38, %s2711_s4 }
 0x495   :  { %598 = vrot.lane.b32.xlu1 %v2922_v38, %s2713_s7 }
 0x496   :  { %600 = vrot.lane.b32.xlu0 %v2922_v38, %s2712_s12 }
 0x499   :  { %1095 = vrot.lane.b32.xlu1 %v2922_v38, %s2714_s26 }
 0x509   :  { %v437_v3 = vpop.xlane.xlu0 %436 }
 0x50a   :  { %2481 = vrcp.f32 %v437_v3 }
 0x50d   :  { %v440_v4 = vpop.xlane.xlu1 %439  ;;  %v446_v5 = vpop.permute.xlu0 %445 }
 0x50e   :  { %2483 = vrcp.f32 %v440_v4  ;;  %2309 = vmatpush3.msra.mxu1 %v446_v5 }
 0x50f   :  { %2313 = vmatprep.subr.mxu1 %v2708_v36 }
 0x511   :  { %v677_v6 = vpop.permute.xlu1 %676  ;;  %v601_v7 = vpop.permute.xlu0 %600 }
 0x512   :  { %2319 = vmatpush3.xpose.msk.msra.mxu0 %vm269_vm2, %v601_v7 }
 0x513   :  { %2328 = vmatprep.subr.mxu0 %v2708_v36 }
 0x514   :  { %v2482_v8 = vpop.eup %2481 }
 0x515   :  { %v443_v9 = vmul.f32 %v2482_v8, %v2478_v59  ;;  %v599_v10 = vpop.permute.xlu1 %598 }
 0x516   :  { %2321 = vmatmul.mubr.msk.f32.vlgmr.msra.gmra.mrb[2].mxu0 %vm269_vm2, %v599_v10 }
 0x517   :  { %2311 = vmatmul.mubr.msk.f32.vlgmr.msra.gmra.mrb[4].mxu1 %vm269_vm2, %v443_v9  ;;  %2330 = vmatprep.mubr.msk.f32.mxu0 %vm2709_vm1, %v2708_v36 }
 0x518   :  { %v2484_v11 = vpop.eup %2483  ;;  %2314 = vmatpush3.msra.mxu1 %v522_v63  ;;  %2315 = vmatprep.mubr.msk.f32.mxu1 %vm2709_vm1, %v2708_v36  ;;  %v597_v63 = vld [vmem:[#allocation7] sm:$0xff] }
 0x519   :  { %v444_v12 = vmul.f32 %v2484_v11, %v2480_v61  ;;  %2323 = vmatprep.subr.mxu1 %v2708_v36  ;;  %v1096_v31 = vpop.permute.xlu1 %1095 }
 0x51b   :  { %2316 = vmatmul.mubr.msk.f32.vlgmr.msra.gmra.mrb[6].mxu1 %vm269_vm2, %v444_v12 }
 0x51c   :  { %2325 = vmatprep.mubr.msk.f32.mxu1 %vm2709_vm1, %v2708_v36 }
 0x51f   :  { %2324 = vmatpush3.xpose.msk.msra.mxu1 %vm269_vm2, %v679_v2 }
 0x520   :  { %2333 = vmatprep.subr.mxu1 %v2708_v36 }
 0x522   :  { %2326 = vmatmul.mubr.msk.f32.vlgmr.msra.gmra.mrb[8].mxu1 %vm269_vm2, %v677_v6 }
 0x523   :  { %2335 = vmatprep.mubr.msk.f32.mxu1 %vm2709_vm1, %v2708_v36 }
 0x5e9   :  { %v672_v13 = vpop.f32.mrb[2].mxu0 }
 0x5ea   :  { %v2975_v14 = vpop.f32.mrb[4].mxu1  ;;  %v2322_v15 = vpop.f32.mrb[3].mxu0  ;;  %v754_v29 = vsel %vm2937_vm3, %v672_v13, -1e+30 }
 0x5eb   :  { %v2312_v16 = vpop.f32.mrb[5].mxu1  ;;  %v756_v30 = vsel %vm269_vm2, %v754_v29, -inf }
 0x5ee   :  { %v2977_v17 = vpop.f32.mrb[6].mxu1 }
 0x5ef   :  { %v2317_v18 = vpop.f32.mrb[7].mxu1 }
 0x5f0   :  { %v1425_v18 = vld [vmem:[#allocation7 + $0x10] sm:$0xff] }
 0x5f5   :  { %v750_v19 = vpop.f32.mrb[8].mxu1 }
 0x5f6   :  { %v755_v20 = vsel %vm2937_vm3, %v750_v19, -1e+30  ;;  %v2327_v21 = vpop.f32.mrb[9].mxu1 }
 0x5f7   :  { %v759_v22 = vsel %vm269_vm2, %v755_v20, -inf }
 0x5f8   :  { %760 = vmax.xlane.f32.xlu0 %v759_v22 }
 0x60e   :  { %854 = vrot.lane.b32.xlu0 %v2919_v37, %s2715_s13 }
 0x612   :  { %1093 = vrot.lane.b32.xlu0 %v2922_v38, %s2716_s15 }
 0x616   :  { %1171 = vrot.lane.b32.xlu0 %v2919_v37, %s2716_s15 }
 0x685   :  { %v761_v23 = vpop.xlane.xlu0 %760 }
 0x686   :  { %v763_v24 = vsub.f32 %v755_v20, %v761_v23 }
 0x688   :  { %v766_v25 = vmul.f32 1.442695, %v763_v24 }
 0x689   :  { %v855_v26 = vpop.permute.xlu0 %854 }
 0x68a   :  { %2485 = vpow2.f32 %v766_v25  ;;  %2334 = vmatpush3.msra.mxu1 %v855_v26 }
 0x68b   :  { %2348 = vmatprep.subr.mxu1 %v2708_v36 }
 0x68d   :  { %v1094_v35 = vpop.permute.xlu0 %1093 }
 0x691   :  { %v1172_v40 = vpop.permute.xlu0 %1171 }
 0x694   :  { %v2486_v27 = vpop.eup %2485 }
 0x695   :  { %v771_v28 = vsel %vm269_vm2, %v2486_v27, 0.0 }
 0x696   :  { %772 = vadd.xlane.f32.xlu1 %v771_v28 }
 0x6a7   :  { %1173 = vrot.lane.b32.xlu1 %v2919_v37, %s2714_s26 }
 0x6cb   :  { %757 = vmax.xlane.f32.xlu1 %v756_v30 }
 0x723   :  { %v773_v32 = vpop.xlane.xlu1 %772 }
 0x724   :  { %2487 = vrcp.f32 %v773_v32 }
 0x727   :  { %v1174_v39 = vpop.permute.xlu1 %1173 }
 0x72e   :  { %v2488_v33 = vpop.eup %2487 }
 0x72f   :  { %v777_v34 = vmul.f32 %v2488_v33, %v2486_v27 }
 0x731   :  { %2336 = vmatmul.mubr.msk.f32.vlgmr.msra.gmra.mrb[10].mxu1 %vm269_vm2, %v777_v34 }
 0x732   :  { %2349 = vmatpush3.xpose.msk.msra.mxu1 %vm269_vm2, %v1096_v31  ;;  %2350 = vmatprep.mubr.msk.f32.mxu1 %vm2709_vm1, %v2708_v36 }
 0x733   :  { %2353 = vmatprep.subr.mxu1 %v2708_v36 }
 0x735   :  { %2351 = vmatmul.mubr.msk.f32.vlgmr.msra.gmra.mrb[12].mxu1 %vm269_vm2, %v1094_v35 }
 0x736   :  { %2354 = vmatpush3.xpose.msk.msra.mxu1 %vm269_vm2, %v1174_v39  ;;  %2355 = vmatprep.mubr.msk.f32.mxu1 %vm2709_vm1, %v2708_v36 }
 0x737   :  { %2363 = vmatprep.subr.mxu1 %v2708_v36 }
 0x739   :  { %2356 = vmatmul.mubr.msk.f32.vlgmr.msra.gmra.mrb[14].mxu1 %vm269_vm2, %v1172_v40 }
 0x73a   :  { %2365 = vmatprep.mubr.msk.f32.mxu1 %vm2709_vm1, %v2708_v36 }
 0x758   :  { %v758_v41 = vpop.xlane.xlu1 %757 }
 0x759   :  { %v762_v42 = vsub.f32 %v754_v29, %v758_v41 }
 0x75b   :  { %v764_v43 = vmul.f32 1.442695, %v762_v42 }
 0x75d   :  { %2489 = vpow2.f32 %v764_v43 }
 0x767   :  { %v2490_v45 = vpop.eup %2489 }
 0x768   :  { %v768_v46 = vsel %vm269_vm2, %v2490_v45, 0.0 }
 0x769   :  { %769 = vadd.xlane.f32.xlu0 %v768_v46 }
 0x77f   :  { %778 = vrot.lane.b32.xlu0 %v2922_v38, %s2715_s13 }
 0x783   :  { %1349 = vrot.lane.b32.xlu0 %v2919_v37, %s2717_s2 }
 0x787   :  { %1511 = vrot.lane.b32.xlu0 %v2922_v38, %s2718_s14 }
 0x78b   :  { %1589 = vrot.lane.b32.xlu0 %v2919_v37, %s2718_s14 }
 0x78f   :  { %1509 = vrot.lane.b32.xlu0 %v2922_v38, %s2719_s17 }
 0x7f6   :  { %v770_v47 = vpop.xlane.xlu0 %769 }
 0x7f7   :  { %2491 = vrcp.f32 %v770_v47 }
 0x7fa   :  { %v779_v48 = vpop.permute.xlu0 %778 }
 0x7fb   :  { %2329 = vmatpush3.msra.mxu0 %v779_v48 }
 0x7fc   :  { %2338 = vmatprep.subr.mxu0 %v930_v62 }
 0x7fe   :  { %v1350_v49 = vpop.permute.xlu0 %1349 }
 0x7ff   :  { %2364 = vmatpush3.msra.mxu1 %v1350_v49 }
 0x800   :  { %2373 = vmatprep.subr.mxu1 %v2708_v36 }
 0x801   :  { %v2492_v50 = vpop.eup %2491 }
 0x802   :  { %v776_v51 = vmul.f32 %v2492_v50, %v2490_v45  ;;  %v1512_v20 = vpop.permute.xlu0 %1511 }
 0x804   :  { %2331 = vmatmul.mubr.msk.f32.vlgmr.msra.gmra.mrb[4].mxu0 %vm269_vm2, %v776_v51  ;;  %v926_v52 = vpop.f32.mrb[10].mxu1 }
 0x805   :  { %v2337_v53 = vpop.f32.mrb[11].mxu1  ;;  %2339 = vmatpush3.msra.mxu0 %v930_v62 }
 0x806   :  { %2343 = vmatprep.subr.mxu0 %v597_v63  ;;  %v1590_v23 = vpop.permute.xlu0 %1589 }
 0x808   :  { %v1167_v54 = vpop.f32.mrb[12].mxu1 }
 0x809   :  { %v1249_v55 = vsel %vm2937_vm3, %v1167_v54, -1e+30  ;;  %v2352_v56 = vpop.f32.mrb[13].mxu1 }
 0x80a   :  { %v1251_v57 = vsel %vm269_vm2, %v1249_v55, -inf  ;;  %v1510_v24 = vpop.permute.xlu0 %1509 }
 0x80b   :  { %1252 = vmax.xlane.f32.xlu1 %v1251_v57  ;;  %v1841_v57 = vld [vmem:[#allocation7 + $0x18] sm:$0xff] }
 0x80c   :  { %v1245_v58 = vpop.f32.mrb[14].mxu1 }
 0x80d   :  { %v1250_v59 = vsel %vm2937_vm3, %v1245_v58, -1e+30  ;;  %v2357_v60 = vpop.f32.mrb[15].mxu1 }
 0x80e   :  { %v1254_v61 = vsel %vm269_vm2, %v1250_v59, -inf }
 0x80f   :  { %1255 = vmax.xlane.f32.xlu1 %v1254_v61 }
 0x898   :  { %v1253_v2 = vpop.xlane.xlu1 %1252 }
 0x899   :  { %v1257_v3 = vsub.f32 %v1249_v55, %v1253_v2 }
 0x89b   :  { %v1259_v4 = vmul.f32 1.442695, %v1257_v3 }
 0x89c   :  { %v1256_v5 = vpop.xlane.xlu1 %1255 }
 0x89d   :  { %2493 = vpow2.f32 %v1259_v4  ;;  %v1258_v6 = vsub.f32 %v1250_v59, %v1256_v5 }
 0x89f   :  { %v1261_v7 = vmul.f32 1.442695, %v1258_v6 }
 0x8a1   :  { %2495 = vpow2.f32 %v1261_v7 }
 0x8a7   :  { %v2494_v8 = vpop.eup %2493 }
 0x8a8   :  { %v1263_v9 = vsel %vm269_vm2, %v2494_v8, 0.0 }
 0x8a9   :  { %1264 = vadd.xlane.f32.xlu1 %v1263_v9 }
 0x8ab   :  { %v2496_v10 = vpop.eup %2495 }
 0x8ac   :  { %v1266_v11 = vsel %vm269_vm2, %v2496_v10, 0.0 }
 0x8ad   :  { %1267 = vadd.xlane.f32.xlu1 %v1266_v11 }
 0x8be   :  { %1273 = vrot.lane.b32.xlu1 %v2922_v38, %s2717_s2 }
 0x8c2   :  { %1587 = vrot.lane.b32.xlu1 %v2919_v37, %s2719_s17 }
 0x8d7   :  { %v850_v12 = vpop.f32.mrb[4].mxu0 }
 0x8d8   :  { %v2332_v13 = vpop.f32.mrb[5].mxu0  ;;  %2340 = vmatprep.mubr.msk.f32.mxu0 %vm269_vm2, %v850_v12 }
 0x8d9   :  { %2341 = vmatmul.mubr.msk.f32.vlgmr.msra.gmra.mrb[6].mxu0 %vm269_vm2, %v926_v52  ;;  %v1971_v13 = vld [vmem:[#allocation11] sm:$0xff] }
 0x8da   :  { %2345 = vmatprep.mubr.msk.f32.mxu0 %vm269_vm2, %v2975_v14  ;;  %2344 = vmatpush3.msra.mxu0 %v597_v63 }
 0x8db   :  { %2358 = vmatprep.subr.mxu0 %v2708_v36 }
 0x8e1   :  { %2346 = vmatmul.mubr.msk.f32.vlgmr.msra.gmra.mrb[6].mxu0 %vm269_vm2, %v2977_v17 }
 0x8e2   :  { %2360 = vmatprep.mubr.msk.f32.mxu0 %vm2709_vm1, %v2708_v36 }
 0x936   :  { %v1265_v15 = vpop.xlane.xlu1 %1264 }
 0x937   :  { %2497 = vrcp.f32 %v1265_v15  ;;  %v1972_v15 = vld [vmem:[#allocation11 + $0x8] sm:$0xff] }
 0x93a   :  { %v1268_v16 = vpop.xlane.xlu1 %1267 }
 0x93b   :  { %2499 = vrcp.f32 %v1268_v16  ;;  %v2428_v16 = vpack.c.bf16 %v1972_v15, %v1971_v13 }
 0x93e   :  { %v1274_v19 = vpop.permute.xlu1 %1273 }
 0x93f   :  { %2359 = vmatpush3.msra.mxu0 %v1274_v19  ;;  %v1974_v19 = vld [vmem:[#allocation11 + $0x18] sm:$0xff] }
 0x940   :  { %2368 = vmatprep.subr.mxu0 %v1425_v18 }
 0x941   :  { %v2498_v21 = vpop.eup %2497 }
 0x942   :  { %v1271_v14 = vmul.f32 %v2498_v21, %v2494_v8  ;;  %v1588_v29 = vpop.permute.xlu1 %1587  ;;  %v2065_v21 = vld [vmem:[%s3132_s9] sm:$0xff] }
 0x944   :  { %2361 = vmatmul.mubr.msk.f32.vlgmr.msra.gmra.mrb[8].mxu0 %vm269_vm2, %v1271_v14  ;;  %v2066_v14 = vld [vmem:[%s3132_s9 + $0x8] sm:$0xff] }
 0x945   :  { %v2500_v22 = vpop.eup %2499  ;;  %2369 = vmatpush3.msra.mxu0 %v1425_v18  ;;  %v1973_v18 = vld [vmem:[#allocation11 + $0x10] sm:$0xff] }
 0x946   :  { %v1272_v17 = vmul.f32 %v2500_v22, %v2496_v10  ;;  %2378 = vmatprep.subr.mxu0 %v2708_v36  ;;  %v2436_v22 = vpack.c.bf16 %v2066_v14, %v2065_v21 }
 0x948   :  { %2366 = vmatmul.mubr.msk.f32.vlgmr.msra.gmra.mrb[16].mxu1 %vm269_vm2, %v1272_v17 }
 0x949   :  { %2374 = vmatpush3.xpose.msk.msra.mxu1 %vm269_vm2, %v1512_v20  ;;  %2375 = vmatprep.mubr.msk.f32.mxu1 %vm2709_vm1, %v2708_v36  ;;  %v2432_v20 = vpack.c.bf16 %v1974_v19, %v1973_v18 }
 0x94a   :  { %2383 = vmatprep.subr.mxu1 %v2708_v36 }
 0x94c   :  { %2376 = vmatmul.mubr.msk.f32.vlgmr.msra.gmra.mrb[18].mxu1 %vm269_vm2, %v1510_v24 }
 0x94d   :  { %2385 = vmatprep.mubr.msk.f32.mxu1 %vm2709_vm1, %v2708_v36 }
 0xa17   :  { %v1345_v25 = vpop.f32.mrb[8].mxu0 }
 0xa18   :  { %v2362_v26 = vpop.f32.mrb[9].mxu0  ;;  %2370 = vmatprep.mubr.msk.f32.mxu0 %vm269_vm2, %v1345_v25 }
 0xa1b   :  { %v1421_v27 = vpop.f32.mrb[16].mxu1 }
 0xa1c   :  { %v2367_v28 = vpop.f32.mrb[17].mxu1  ;;  %2371 = vmatmul.mubr.msk.f32.vlgmr.msra.gmra.mrb[6].mxu0 %vm269_vm2, %v1421_v27 }
 0xa1d   :  { %2379 = vmatpush3.xpose.msk.msra.mxu0 %vm269_vm2, %v1590_v23  ;;  %2380 = vmatprep.mubr.msk.f32.mxu0 %vm2709_vm1, %v2708_v36 }
 0xa1e   :  { %2388 = vmatprep.subr.mxu0 %v2708_v36 }
 0xa1f   :  { %v1583_v30 = vpop.f32.mrb[18].mxu1 }
 0xa20   :  { %v1665_v31 = vsel %vm2937_vm3, %v1583_v30, -1e+30  ;;  %v2377_v32 = vpop.f32.mrb[19].mxu1  ;;  %2381 = vmatmul.mubr.msk.f32.vlgmr.msra.gmra.mrb[10].mxu0 %vm269_vm2, %v1588_v29  ;;  %v2217_v29 = vld [vmem:[#allocation8] ss:$0 sm:$0xff] }
 0xa21   :  { %v1667_v33 = vsel %vm269_vm2, %v1665_v31, -inf  ;;  %2390 = vmatprep.mubr.msk.f32.mxu0 %vm2709_vm1, %v2708_v36 }
 0xa22   :  { %1668 = vmax.xlane.f32.xlu0 %v1667_v33  ;;  %v2218_v33 = vld [vmem:[#allocation10] ss:$0 sm:$0xff] }
 0xaaf   :  { %v1669_v34 = vpop.xlane.xlu0 %1668 }
 0xab0   :  { %v1673_v35 = vsub.f32 %v1665_v31, %v1669_v34 }
 0xab2   :  { %v1675_v39 = vmul.f32 1.442695, %v1673_v35 }
 0xab4   :  { %2501 = vpow2.f32 %v1675_v39 }
 0xabe   :  { %v2502_v40 = vpop.eup %2501 }
 0xabf   :  { %v1679_v41 = vsel %vm269_vm2, %v2502_v40, 0.0 }
 0xac0   :  { %1680 = vadd.xlane.f32.xlu0 %v1679_v41  ;;  %v2067_v41 = vld [vmem:[%s3132_s9 + $0x10] sm:$0xff] }
 0xaf3   :  { %v1661_v42 = vpop.f32.mrb[10].mxu0 }
 0xaf4   :  { %v1666_v43 = vsel %vm2937_vm3, %v1661_v42, -1e+30  ;;  %v2382_v45 = vpop.f32.mrb[11].mxu0  ;;  %v2068_v42 = vld [vmem:[%s3132_s9 + $0x18] sm:$0xff]  ;;  %s2721_s9 = smov [#allocation14]  }
 0xaf5   :  { %v1670_v46 = vsel %vm269_vm2, %v1666_v43, -inf  ;;  %v2219_v45 = vld [vmem:[#allocation13] ss:$0 sm:$0xff]  ;;  %s2166_s18 = sshll.u32 %s2721_s9, 4  ;;  %s2167_s18 = int_to_ptr.vmem [resolvable:$true] %s2166_s18 }
 0xaf6   :  { %1671 = vmax.xlane.f32.xlu1 %v1670_v46  ;;  %s2667_s8 = scalar_lea.vmem %s2167_s18, 256  ;;  %p2672_p1 = scmp.lt.s32.totalorder %s2167_s18, %s2167_s18 }
 0xaf7   :  { %p2668_p0 = scmp.ne.s32.totalorder %s2167_s18, %s2667_s8  ;;  %p2673_p2 = scmp.lt.s32.totalorder %s2667_s8, %s2667_s8 }
 0xaf9   :  { %p2674_p3 = por %p2673_p2, %p2672_p1 }
 0xafb   :  { %p2675_p4 = pnand %p2674_p3, %p2668_p0 }
 0xb07   :  { %1765 = vrot.lane.b32.xlu1 %v2919_v37, %s2720_s19 }
 0xb4d   :  { %v1681_v44 = vpop.xlane.xlu0 %1680 }
 0xb83   :  { %v1672_v36 = vpop.xlane.xlu1 %1671 }
 0xb84   :  { %v1674_v47 = vsub.f32 %v1666_v43, %v1672_v36  ;;  %v2440_v43 = vpack.c.bf16 %v2068_v42, %v2067_v41 }
 0xb86   :  { %v1677_v48 = vmul.f32 1.442695, %v1674_v47 }
 0xb87   :  { %v1766_v49 = vpop.permute.xlu1 %1765 }
 0xb88   :  { %2503 = vpow2.f32 %v1677_v48  ;;  %2389 = vmatpush3.msra.mxu0 %v1766_v49 }
 0xb89   :  { %2505 = vrcp.f32 %v1681_v44  ;;  %2393 = vmatprep.subr.mxu0 %v1841_v57 }
 0xb92   :  { %v2504_v50 = vpop.eup %2503 }
 0xb93   :  { %v1682_v51 = vsel %vm269_vm2, %v2504_v50, 0.0  ;;  %v2506_v53 = vpop.eup %2505 }
 0xb94   :  { %1683 = vadd.xlane.f32.xlu0 %v1682_v51  ;;  %v1687_v54 = vmul.f32 %v2506_v53, %v2502_v40  ;;  %v2222_v51 = vld [vmem:[%s3133_s10] ss:$0 sm:$0xff] }
 0xbaa   :  { %1689 = vrot.lane.b32.xlu0 %v2922_v38, %s2720_s19 }
 0xc21   :  { %v1684_v52 = vpop.xlane.xlu0 %1683 }
 0xc22   :  { %2507 = vrcp.f32 %v1684_v52 }
 0xc25   :  { %v1690_v55 = vpop.permute.xlu0 %1689 }
 0xc26   :  { %2384 = vmatpush3.msra.mxu1 %v1690_v55 }
 0xc27   :  { %2386 = vmatmul.mubr.msk.f32.vlgmr.msra.gmra.mrb[20].mxu1 %vm269_vm2, %v1687_v54  ;;  %2429 = vmatprep.subr.bf16.mxu1 %v2428_v16 }
 0xc28   :  { %2431 = vmatpush3.bf16.msra.mxu1 %v2428_v16 }
 0xc29   :  { %2433 = vmatprep.subr.bf16.mxu1 %v2432_v20 }
 0xc2c   :  { %v2508_v37 = vpop.eup %2507  ;;  %2435 = vmatpush3.bf16.msra.mxu1 %v2432_v20 }
 0xc2d   :  { %v1688_v56 = vmul.f32 %v2508_v37, %v2504_v50 }
 0xc2f   :  { %2391 = vmatmul.mubr.msk.f32.vlgmr.msra.gmra.mrb[12].mxu0 %vm269_vm2, %v1688_v56 }
 0xc30   :  { %2394 = vmatpush3.msra.mxu0 %v1841_v57 }
 0xc31   :  { %2437 = vmatprep.subr.bf16.mxu0 %v2436_v22 }
 0xcfa   :  { %v1761_v58 = vpop.f32.mrb[20].mxu1 }
 0xcfb   :  { %v2387_v59 = vpop.f32.mrb[21].mxu1  ;;  %2395 = vmatprep.mubr.msk.f32.mxu0 %vm269_vm2, %v1761_v58 }
 0xd02   :  { %v1837_v38 = vpop.f32.mrb[12].mxu0 }
 0xd03   :  { %v2392_v60 = vpop.f32.mrb[13].mxu0  ;;  %2396 = vmatmul.mubr.msk.f32.vlgmr.msra.gmra.mrb[6].mxu0 %vm269_vm2, %v1837_v38 }
 0xd04   :  { %2439 = vmatpush3.bf16.msra.mxu0 %v2436_v22 }
 0xd05   :  { %2441 = vmatprep.subr.bf16.mxu0 %v2440_v43 }
 0xd08   :  { %2443 = vmatpush3.bf16.msra.mxu0 %v2440_v43 }
 0xdd6   :  { %v2397_v61 = vpop.f32.mrb[6].mxu0 }
 0xdd7   :  { %v3072_v62 = vadd.f32 %v2397_v61, %v2895_v1  ;;  %v1914_v63 = vpop.f32.mrb[7].mxu0 }
 0xdd8   :  { %v3075_v2 = vadd.f32 %v1914_v63, %v2893_v0 }
 0xdd9   :  { %v1932_v3 = vsel %vm132_vm0, %v3072_v62, 0.0 }
 0xdda   :  { %1933 = vadd.xlane.f32.xlu0 %v1932_v3  ;;  %v1929_v4 = vsel %vm132_vm0, %v3075_v2, 0.0 }
 0xddb   :  { %1930 = vadd.xlane.f32.xlu1 %v1929_v4 }
 0xe67   :  { %v1934_v5 = vpop.xlane.xlu0 %1933 }
 0xe68   :  { %v1936_v6 = vmul.f32 0.03125, %v1934_v5  ;;  %v1931_v7 = vpop.xlane.xlu1 %1930 }
 0xe69   :  { %v1935_v8 = vmul.f32 0.03125, %v1931_v7 }
 0xe6a   :  { %v1938_v9 = vsub.f32 %v3072_v62, %v1936_v6 }
 0xe6b   :  { %v1937_v1 = vsub.f32 %v3075_v2, %v1935_v8 }
 0xe6c   :  { %v1940_v10 = vmul.f32 %v1938_v9, %v1938_v9 }
 0xe6d   :  { %v1939_v11 = vmul.f32 %v1937_v1, %v1937_v1 }
 0xe6e   :  { %v1944_v0 = vsel %vm132_vm0, %v1940_v10, 0.0 }
 0xe6f   :  { %1945 = vadd.xlane.f32.xlu1 %v1944_v0  ;;  %v1941_v12 = vsel %vm132_vm0, %v1939_v11, 0.0 }
 0xe70   :  { %1942 = vadd.xlane.f32.xlu0 %v1941_v12 }
 0xefc   :  { %v1946_v23 = vpop.xlane.xlu1 %1945 }
 0xefd   :  { %v1948_v17 = vmul.f32 0.03125, %v1946_v23  ;;  %v1943_v24 = vpop.xlane.xlu0 %1942 }
 0xefe   :  { %v1947_v25 = vmul.f32 0.03125, %v1943_v24 }
 0xeff   :  { %v1950_v26 = vadd.f32 1e-05, %v1948_v17 }
 0xf00   :  { %v1949_v27 = vadd.f32 1e-05, %v1947_v25 }
 0xf01   :  { %2509 = vrsqrt.f32 %v1950_v26 }
 0xf02   :  { %2511 = vrsqrt.f32 %v1949_v27 }
 0xf0b   :  { %v2510_v28 = vpop.eup %2509 }
 0xf0c   :  { %v2512_v30 = vpop.eup %2511  ;;  %v1954_v31 = vmul.f32 %v2510_v28, %v1938_v9 }
 0xf0d   :  { %v1953_v32 = vmul.f32 %v2512_v30, %v1937_v1 }
 0xf0e   :  { %v1962_v34 = vmul.f32 %v2217_v29, %v1954_v31 }
 0xf0f   :  { %v1961_v35 = vmul.f32 %v2217_v29, %v1953_v32 }
 0xf10   :  { %v1970_v40 = vadd.f32 %v2218_v33, %v1962_v34 }
 0xf11   :  { %v1969_v39 = vadd.f32 %v2218_v33, %v1961_v35 }
 0xf13   :  { %2406 = vmatprep.mubr.msk.f32.mxu1 %vm132_vm0, %v1969_v39 }
 0xf14   :  { %2407 = vmatmul.mubr.msk.f32.vlgmr.msra.gmra.mrb[22].mxu1 %vm132_vm0, %v1970_v40 }
 0xfe7   :  { %v2408_v46 = vpop.f32.mrb[22].mxu1 }
 0xfe8   :  { %v2060_v36 = vadd.f32 %v2408_v46, %v2219_v45  ;;  %v2054_v47 = vpop.f32.mrb[23].mxu1 }
 0xfe9   :  { %v2055_v48 = vadd.f32 %v2219_v45, %v2054_v47 }
 0xfea   :  { %v2064_v50 = vmax.f32 %v2060_v36, 0.0 }
 0xfeb   :  { %v2063_v49 = vmax.f32 %v2055_v48, 0.0 }
 0xfed   :  { %2417 = vmatprep.mubr.msk.f32.mxu0 %vm132_vm0, %v2063_v49 }
 0xfee   :  { %2418 = vmatmul.mubr.msk.f32.vlgmr.msra.gmra.mrb[14].mxu0 %vm132_vm0, %v2064_v50 }
0x10c1   :  { %v2419_v44 = vpop.f32.mrb[14].mxu0 }
0x10c2   :  { %v2154_v52 = vadd.f32 %v2419_v44, %v2222_v51  ;;  %v2148_v53 = vpop.f32.mrb[15].mxu0 }
0x10c3   :  { %v2149_v54 = vadd.f32 %v2222_v51, %v2148_v53 }
0x10c4   :  { %v2158_v55 = vadd.f32 %v2154_v52, %v3072_v62 }
0x10c5   :  { %v2157_v37 = vadd.f32 %v2149_v54, %v3075_v2 }
0x10c6   :  { %2160 = vst.msk [vmem:[#allocation14 + $0x8] sm:$0xff] %vm132_vm0, %v2158_v55 }
0x10c7   :  { %2159 = vst.msk [vmem:[#allocation14] sm:$0xff] %vm132_vm0, %v2157_v37 }
0x10c8   :  { %2678 = shalt.err (!%p2675_p4)
}
0x10c9   :  { %s2679_s25 = scalar_lea.hbm %s3134_s11, 256 }
0x10ca   :  { %p2680_p5 = scmp.ne.s32.totalorder %s3134_s11, %s2679_s25  ;;  %p2683_p6 = scmp.lt.u32.totalorder %s2679_s25, %s3134_s11 }
0x10cc   :  { %p2685_p7 = pnand %p2683_p6, %p2680_p5 }
0x10ce   :  { %2688 = shalt.err (!%p2685_p7)
}
0x10cf   :  { %2172 = dma.vmem_to_hbm [thread:$0]  %s2167_s18, 256, %s3134_s11, [#allocation4], %s2701_s29, %s2701_s29, %s2702_s30  }
0x10d0   :  { %2697 = dma.done.wait [#allocation4], 256  }
0x10d1   :  { %2698 = vsyncadd [#allocation4], 4294967040 }
0x10d2   :  { %2176 = vsyncpa [#allocation3], 1 }
0x10d3   :  { %2177 = vsyncpa [#allocation6], 1 }
0x10d4   :  { %2178 = vsyncpa [#allocation9], 1 }
0x10d5   :  { %2179 = vsyncpa [#allocation12], 1 }
0x10d6   :  { %2180 = vsyncpa [#allocation4], 1 }

</bundles_post_ra>
